<compile_context>
chip_gen: v6e
topology: v6e:2x2x1
jax: 0.10.0
libtpu: 0.0.40
codegen_flags: <defaults>
</compile_context>

<pallas_src>
import functools

import numpy as np
import jax
import jax.numpy as jnp
from jax import lax
from jax.experimental import pallas as pl
from jax.experimental.pallas import tpu as pltpu


# ----------------------------- Pallas kernel -----------------------------
def _seg_decoder_kernel(x_ref, lnw_ref, lnb_ref, w_ref, b_ref, kt_ref, o_ref,
                        *, eps):
    x = x_ref[...]                    # (B, 1+N, D)
    x = x[:, 1:, :]                   # drop class token -> (B, N, D)

    # LayerNorm (torch semantics: biased variance, eps inside sqrt)
    mu = jnp.mean(x, axis=-1, keepdims=True)
    var = jnp.mean((x - mu) ** 2, axis=-1, keepdims=True)
    xn = (x - mu) * lax.rsqrt(var + eps)
    xn = xn * lnw_ref[...] + lnb_ref[...]

    # Linear: (B, N, D) @ (D, C) -> (B, N, C)
    y = jnp.einsum('bnd,dc->bnc', xn, w_ref[...],
                   preferred_element_type=jnp.float32) + b_ref[...]

    # torch.transpose(1, 2) — done at the smallest tensor (N x C per batch)
    y_t = jnp.swapaxes(y, -1, -2)     # (B, C, N)

    # Bilinear upsample as one matmul with K^T = kron(Rh, Rw)^T : (N, H*W)
    o = jnp.einsum('bcn,nm->bcm', y_t, kt_ref[...],
                   preferred_element_type=jnp.float32)
    o_ref[...] = o                    # (B, C, H*W)  — lane-dense store


# ------------------------- host-side static helpers -------------------------
def _bilinear_matrix(in_size, out_size):
    """Row-interpolation matrix for torch Upsample(mode='bilinear',
    align_corners=False): out = R @ in, R shape (out_size, in_size)."""
    scale = in_size / out_size
    R = np.zeros((out_size, in_size), np.float32)
    for i in range(out_size):
        s = max((i + 0.5) * scale - 0.5, 0.0)
        i0 = int(np.floor(s))
        i1 = min(i0 + 1, in_size - 1)
        w1 = s - i0
        R[i, i0] += 1.0 - w1
        R[i, i1] += w1
    return R


def segmentation_decoder(x, params, *, image_size, patch_size):
    """x: (B, 1 + P*P, dim) -> (B, num_classes, image_size, image_size)."""
    ln_w, ln_b, w, b = params
    B, n_tok, _ = x.shape
    C = w.shape[1]
    P = image_size // patch_size
    assert n_tok == P * P + 1

    # Static separable bilinear weights; kron folds the full 2-D upsample
    # into a single (P*P, H*W) matmul operand.
    Rh = _bilinear_matrix(P, image_size)
    Rw = _bilinear_matrix(P, image_size)
    K_T = jnp.asarray(np.kron(Rh, Rw).T, dtype=jnp.float32)   # (P*P, H*W)
    # TODO(synk): for large image sizes, replace kron(Rh, Rw) with the
    # separable two-matmul form (apply Rw then Rh) and tile it so the
    # working set fits v7x's 64 MiB VMEM.

    out_flat = pl.pallas_call(
        functools.partial(_seg_decoder_kernel, eps=1e-5),
        out_shape=jax.ShapeDtypeStruct((B, C, image_size * image_size),
                                       jnp.float32),
        in_specs=[pl.BlockSpec(memory_space=pltpu.MemorySpace.VMEM)] * 6,
        out_specs=pl.BlockSpec(memory_space=pltpu.MemorySpace.VMEM),
    )(x, ln_w, ln_b, w, b, K_T)

    # Free metadata reshape: (B, C, H*W) -> (B, C, H, W)
    return out_flat.reshape(B, C, image_size, image_size)


# --------------------- pure-JAX reference (verification) ---------------------
def _ref_upsample_bilinear(img, out_size):
    """torch Upsample(mode='bilinear', align_corners=False), gather-based."""
    B, C, P, _ = img.shape
    scale = P / out_size
    d = jnp.arange(out_size, dtype=jnp.float32)
    src = jnp.maximum((d + 0.5) * scale - 0.5, 0.0)
    i0 = jnp.floor(src).astype(jnp.int32)
    i1 = jnp.minimum(i0 + 1, P - 1)
    w1 = src - i0.astype(jnp.float32)
    w0 = 1.0 - w1
    rows = (img[:, :, i0, :] * w0[None, None, :, None]
            + img[:, :, i1, :] * w1[None, None, :, None])       # (B,C,out,P)
    out = (rows[:, :, :, i0] * w0[None, None, None, :]
           + rows[:, :, :, i1] * w1[None, None, None, :])       # (B,C,out,out)
    return out


def _ref_forward(x, params, *, image_size, patch_size):
    ln_w, ln_b, w, b = params
    eps = 1e-5
    x = x[:, 1:]
    mu = jnp.mean(x, axis=-1, keepdims=True)
    var = jnp.mean((x - mu) ** 2, axis=-1, keepdims=True)
    xn = (x - mu) / jnp.sqrt(var + eps) * ln_w + ln_b
    y = xn @ w + b                                              # (B, N, C)
    B, N, C = y.shape
    P = image_size // patch_size
    img = jnp.transpose(y, (0, 2, 1)).reshape(B, C, P, P)
    return _ref_upsample_bilinear(img, image_size)


# ---------------------------------- demo ----------------------------------
if __name__ == "__main__":
    B = 2
    dim = 32
    num_classes = 4
    image_size = 16
    patch_size = 4
    P = image_size // patch_size            # 4 patches per side
    N = P * P                               # 16 tokens (+1 class token)

    key = jax.random.PRNGKey(0)
    kx, kw, kb, kg, kbeta = jax.random.split(key, 5)
    x = jax.random.normal(kx, (B, N + 1, dim), jnp.float32)
    ln_w = 1.0 + 0.1 * jax.random.normal(kg, (1, dim), jnp.float32)
    ln_b = 0.05 * jax.random.normal(kbeta, (1, dim), jnp.float32)
    w = 0.1 * jax.random.normal(kw, (dim, num_classes), jnp.float32)
    b = 0.1 * jax.random.normal(kb, (1, num_classes), jnp.float32)

    params = (ln_w, ln_b, w, b)

    out = segmentation_decoder(x, params,
                               image_size=image_size, patch_size=patch_size)
    out = jax.block_until_ready(out)

    ref = _ref_forward(x, params,
                       image_size=image_size, patch_size=patch_size)
    assert out.shape == (B, num_classes, image_size, image_size)
    assert jnp.allclose(out, ref, atol=1e-4, rtol=1e-4), \
        "mismatch vs JAX reference"

    print("KERNEL_OK")
</pallas_src>

<mosaic_0001>
module attributes {stable_mosaic.version = 11 : i64} {
  func.func @_seg_decoder_kernel(%arg0: memref<2x17x32xf32, #tpu.memory_space<vmem>>, %arg1: memref<1x32xf32, #tpu.memory_space<vmem>>, %arg2: memref<1x32xf32, #tpu.memory_space<vmem>>, %arg3: memref<32x4xf32, #tpu.memory_space<vmem>>, %arg4: memref<1x4xf32, #tpu.memory_space<vmem>>, %arg5: memref<16x256xf32, #tpu.memory_space<vmem>>, %arg6: memref<2x4x256xf32, #tpu.memory_space<vmem>>) attributes {dimension_semantics = [], scalar_prefetch = 0 : i64, scratch_operands = 0 : i64, tpu.core_type = #tpu.core_type<tc>} {
    %c0 = arith.constant 0 : index
    %c0_0 = arith.constant 0 : index
    %c0_1 = arith.constant 0 : index
    %0 = vector.load %arg0[%c0, %c0_0, %c0_1] : memref<2x17x32xf32, #tpu.memory_space<vmem>>, vector<2x17x32xf32>
    %1 = vector.extract_strided_slice %0 {offsets = [0, 1, 0], sizes = [2, 16, 32], strides = [1, 1, 1]} : vector<2x17x32xf32> to vector<2x16x32xf32>
    %cst = arith.constant dense<0.000000e+00> : vector<2x16xf32>
    %2 = vector.multi_reduction <add>, %1, %cst [2] : vector<2x16x32xf32> to vector<2x16xf32>
    %3 = vector.shape_cast %2 : vector<2x16xf32> to vector<2x16x1xf32>
    %cst_2 = arith.constant 3.200000e+01 : f32
    %4 = vector.broadcast %cst_2 : f32 to vector<2x16x1xf32>
    %5 = arith.divf %3, %4 : vector<2x16x1xf32>
    %6 = vector.broadcast %5 : vector<2x16x1xf32> to vector<2x16x32xf32>
    %7 = arith.subf %1, %6 : vector<2x16x32xf32>
    %8 = arith.mulf %7, %7 : vector<2x16x32xf32>
    %cst_3 = arith.constant dense<0.000000e+00> : vector<2x16xf32>
    %9 = vector.multi_reduction <add>, %8, %cst_3 [2] : vector<2x16x32xf32> to vector<2x16xf32>
    %10 = vector.shape_cast %9 : vector<2x16xf32> to vector<2x16x1xf32>
    %cst_4 = arith.constant 3.200000e+01 : f32
    %11 = vector.broadcast %cst_4 : f32 to vector<2x16x1xf32>
    %12 = arith.divf %10, %11 : vector<2x16x1xf32>
    %13 = vector.broadcast %5 : vector<2x16x1xf32> to vector<2x16x32xf32>
    %14 = arith.subf %1, %13 : vector<2x16x32xf32>
    %cst_5 = arith.constant 9.99999974E-6 : f32
    %15 = vector.broadcast %cst_5 : f32 to vector<2x16x1xf32>
    %16 = arith.addf %12, %15 : vector<2x16x1xf32>
    %17 = math.rsqrt %16 : vector<2x16x1xf32>
    %18 = vector.broadcast %17 : vector<2x16x1xf32> to vector<2x16x32xf32>
    %19 = arith.mulf %14, %18 : vector<2x16x32xf32>
    %c0_6 = arith.constant 0 : index
    %c0_7 = arith.constant 0 : index
    %20 = vector.load %arg1[%c0_6, %c0_7] : memref<1x32xf32, #tpu.memory_space<vmem>>, vector<1x32xf32>
    %21 = vector.shape_cast %20 : vector<1x32xf32> to vector<1x1x32xf32>
    %22 = vector.broadcast %21 : vector<1x1x32xf32> to vector<2x16x32xf32>
    %23 = arith.mulf %19, %22 : vector<2x16x32xf32>
    %c0_8 = arith.constant 0 : index
    %c0_9 = arith.constant 0 : index
    %24 = vector.load %arg2[%c0_8, %c0_9] : memref<1x32xf32, #tpu.memory_space<vmem>>, vector<1x32xf32>
    %25 = vector.shape_cast %24 : vector<1x32xf32> to vector<1x1x32xf32>
    %26 = vector.broadcast %25 : vector<1x1x32xf32> to vector<2x16x32xf32>
    %27 = arith.addf %23, %26 : vector<2x16x32xf32>
    %c0_10 = arith.constant 0 : index
    %c0_11 = arith.constant 0 : index
    %28 = vector.load %arg3[%c0_10, %c0_11] : memref<32x4xf32, #tpu.memory_space<vmem>>, vector<32x4xf32>
    "tpu.trace_start"() <{level = 10 : i32, message = "bnd,dc->bnc"}> : () -> ()
    %cst_12 = arith.constant dense<0.000000e+00> : vector<2x16x4xf32>
    %29 = tpu.matmul %27, %28, %cst_12 {dimension_numbers = #tpu.dot_dimension_numbers<[2], [0], [0, 1], [1], [0, 0, 0, 1, 1, 1], [], []>} : vector<2x16x32xf32>, vector<32x4xf32>, vector<2x16x4xf32> -> vector<2x16x4xf32>
    "tpu.trace_stop"() : () -> ()
    %c0_13 = arith.constant 0 : index
    %c0_14 = arith.constant 0 : index
    %30 = vector.load %arg4[%c0_13, %c0_14] : memref<1x4xf32, #tpu.memory_space<vmem>>, vector<1x4xf32>
    %31 = vector.shape_cast %30 : vector<1x4xf32> to vector<1x1x4xf32>
    %32 = vector.broadcast %31 : vector<1x1x4xf32> to vector<2x16x4xf32>
    %33 = arith.addf %29, %32 : vector<2x16x4xf32>
    %34 = tpu.transpose %33, [0, 2, 1] : vector<2x16x4xf32> -> vector<2x4x16xf32>
    %c0_15 = arith.constant 0 : index
    %c0_16 = arith.constant 0 : index
    %35 = vector.load %arg5[%c0_15, %c0_16] : memref<16x256xf32, #tpu.memory_space<vmem>>, vector<16x256xf32>
    "tpu.trace_start"() <{level = 10 : i32, message = "bcn,nm->bcm"}> : () -> ()
    %cst_17 = arith.constant dense<0.000000e+00> : vector<2x4x256xf32>
    %36 = tpu.matmul %34, %35, %cst_17 {dimension_numbers = #tpu.dot_dimension_numbers<[2], [0], [0, 1], [1], [0, 0, 0, 1, 1, 1], [], []>} : vector<2x4x16xf32>, vector<16x256xf32>, vector<2x4x256xf32> -> vector<2x4x256xf32>
    "tpu.trace_stop"() : () -> ()
    %c0_18 = arith.constant 0 : index
    %c0_19 = arith.constant 0 : index
    %c0_20 = arith.constant 0 : index
    %37 = vector.load %arg6[%c0_18, %c0_19, %c0_20] : memref<2x4x256xf32, #tpu.memory_space<vmem>>, vector<2x4x256xf32>
    tpu.vector_store %arg6[%c0_18, %c0_19, %c0_20], %36 {strides = array<i32>} : memref<2x4x256xf32, #tpu.memory_space<vmem>>, vector<2x4x256xf32>,
    return
  }
}

</mosaic_0001>

<bundles_post_ra>
// kernel: tpu_custom_call.1
= control target key start
LH: loop header
LB: loop body
LE: loop exit
PB: predicated region body
PF: predicated region fallthrough
CT: control target
= control target key end

     0   :  { %vm30_vm0 = vcmask 261121   ;;  %vm38_vm1 = vcmask 253952   ;;  %vm34_vm2 = vcmask 261120   ;;  %s639_s0 = inlined_call_operand.vmem [shape: f32[2,17,32], index: 0, kind: input, shape index: {}]   ;;  %s640_s1 = inlined_call_operand.vmem [shape: f32[1,32], index: 1, kind: input, shape index: {}]   ;;  %s641_s2 = inlined_call_operand.vmem [shape: f32[1,32], index: 2, kind: input, shape index: {}]   ;;  %s642_s3 = inlined_call_operand.vmem [shape: f32[32,4], index: 3, kind: input, shape index: {}]   ;;  %s643_s4 = inlined_call_operand.vmem [shape: f32[1,4], index: 4, kind: input, shape index: {}]   ;;  %s644_s5 = inlined_call_operand.vmem [shape: f32[16,256], index: 5, kind: input, shape index: {}]   ;;  %s645_s6 = inlined_call_operand.hbm [shape: f32[2,4,256], index: 6, kind: output, shape index: {}]  }
   0x1   :  { %v24_v0 = vld [vmem:[%s639_s0] sm:$0xff]  ;;  %v26_v1 = vld [vmem:[%s639_s0 + $0x10] sm:$0x1]  ;;  %v25_v2 = vld [vmem:[%s639_s0 + $0x8] sm:$0xff] }
   0x2   :  { %v31_v3 = vsel %vm30_vm0, %v24_v0, 0.0  ;;  %v39_v4 = vsel %vm38_vm1, %v26_v1, 0.0  ;;  %v27_v5 = vld [vmem:[%s639_s0 + $0x18] sm:$0xff]  ;;  %v35_v6 = vsel %vm34_vm2, %v25_v2, 0.0 }
   0x3   :  { %32 = vadd.xlane.f32.xlu0 %v31_v3  ;;  %40 = vadd.xlane.f32.xlu1 %v39_v4  ;;  %v42_v7 = vsel %vm30_vm0, %v27_v5, 0.0 }
   0x4   :  { %11 = vsyncpa [#allocation3], 0  ;;  %v28_v8 = vld [vmem:[%s639_s0 + $0x20] sm:$0xff]  ;;  %v29_v9 = vld [vmem:[%s639_s0 + $0x28] sm:$0x1]  ;;  %vm155_vm3 = vcmask 1046528  }
   0x5   :  { %v45_v10 = vsel %vm34_vm2, %v28_v8, 0.0  ;;  %v48_v11 = vsel %vm38_vm1, %v29_v9, 0.0  ;;  %v141_v42 = vld [vmem:[%s642_s3 + $0x18] sm:$0xff]  ;;  %v140_v43 = vld [vmem:[%s642_s3 + $0x10] sm:$0xff]  ;;  %v139_v44 = vld [vmem:[%s642_s3 + $0x8] sm:$0xff]  ;;  %vm330_vm4 = vcmask 130048  }
   0x6   :  { %444 = vmatprep.subr.mxu0 %v141_v42  ;;  %v138_v45 = vld [vmem:[%s642_s3] sm:$0xff] }
   0x7   :  { %36 = vadd.xlane.f32.xlu0 %v35_v6  ;;  %43 = vadd.xlane.f32.xlu1 %v42_v7 }
   0x8   :  { %445 = vmatpush3.msra.mxu0 %v141_v42 }
   0x9   :  { %446 = vmatprep.subr.mxu0 %v140_v43 }
   0xa   :  { %447 = vmatpush3.msra.mxu0 %v140_v43 }
   0xb   :  { %46 = vadd.xlane.f32.xlu0 %v45_v10  ;;  %49 = vadd.xlane.f32.xlu1 %v48_v11 }
   0xc   :  { %448 = vmatprep.subr.mxu0 %v139_v44 }
   0xd   :  { %449 = vmatpush3.msra.mxu0 %v139_v44 }
   0xe   :  { %450 = vmatprep.subr.mxu0 %v138_v45 }
   0xf   :  { %451 = vmatpush3.msra.mxu0 %v138_v45  ;;  %v324_v45 = vld [vmem:[%s644_s5 + $0x8] sm:$0xff] }
  0x8c   :  { %v33_v12 = vpop.xlane.xlu0 %32  ;;  %v41_v13 = vpop.xlane.xlu1 %40 }
  0x8d   :  { %v52_v14 = vmul.f32 0.03125, %v33_v12  ;;  %v54_v15 = vmul.f32 0.03125, %v41_v13 }
  0x8f   :  { %v559_v16 = vsub.f32 %v24_v0, %v52_v14  ;;  %v561_v17 = vsub.f32 %v26_v1, %v54_v15  ;;  %v428_v1 = vld [vmem:[%s640_s1] ss:$0 sm:$0xff] }
  0x90   :  { %v37_v18 = vpop.xlane.xlu0 %36  ;;  %v44_v19 = vpop.xlane.xlu1 %43 }
  0x91   :  { %v53_v20 = vmul.f32 0.03125, %v37_v18  ;;  %v55_v21 = vmul.f32 0.03125, %v44_v19  ;;  %v64_v22 = vmul.f32 %v559_v16, %v559_v16  ;;  %v66_v23 = vmul.f32 %v561_v17, %v561_v17 }
  0x93   :  { %v567_v24 = vsub.f32 %v25_v2, %v53_v20  ;;  %v569_v25 = vsub.f32 %v27_v5, %v55_v21  ;;  %v70_v26 = vsel %vm30_vm0, %v64_v22, 0.0  ;;  %v76_v29 = vsel %vm38_vm1, %v66_v23, 0.0  ;;  %v429_v5 = vld [vmem:[%s641_s2] ss:$0 sm:$0xff] }
  0x94   :  { %71 = vadd.xlane.f32.xlu0 %v70_v26  ;;  %v47_v27 = vpop.xlane.xlu0 %46  ;;  %v50_v28 = vpop.xlane.xlu1 %49 }
  0x95   :  { %v56_v30 = vmul.f32 0.03125, %v47_v27  ;;  %v57_v31 = vmul.f32 0.03125, %v50_v28  ;;  %v65_v32 = vmul.f32 %v567_v24, %v567_v24  ;;  %v67_v33 = vmul.f32 %v569_v25, %v569_v25 }
  0x97   :  { %v577_v34 = vsub.f32 %v28_v8, %v56_v30  ;;  %v579_v35 = vsub.f32 %v29_v9, %v57_v31  ;;  %v73_v36 = vsel %vm34_vm2, %v65_v32, 0.0  ;;  %v79_v37 = vsel %vm30_vm0, %v67_v33, 0.0 }
  0x98   :  { %77 = vadd.xlane.f32.xlu0 %v76_v29  ;;  %74 = vadd.xlane.f32.xlu1 %v73_v36 }
  0x99   :  { %v68_v38 = vmul.f32 %v577_v34, %v577_v34  ;;  %v69_v39 = vmul.f32 %v579_v35, %v579_v35 }
  0x9b   :  { %v82_v40 = vsel %vm34_vm2, %v68_v38, 0.0  ;;  %v85_v41 = vsel %vm38_vm1, %v69_v39, 0.0  ;;  %v430_v39 = vld [vmem:[%s643_s4] ss:$0 sm:$0xff]  ;;  %s497_s4 = smov [#allocation2]  }
  0x9c   :  { %80 = vadd.xlane.f32.xlu1 %v79_v37  ;;  %83 = vadd.xlane.f32.xlu0 %v82_v40  ;;  %v325_v37 = vld [vmem:[%s644_s5 + $0x10] sm:$0xff]  ;;  %s417_s27 = sshll.u32 %s497_s4, 4  ;;  %s418_s27 = int_to_ptr.vmem [resolvable:$true] %s417_s27 }
  0x9d   :  { %p479_p1 = scmp.lt.s32.totalorder %s418_s27, %s418_s27 }
  0xa0   :  { %86 = vadd.xlane.f32.xlu1 %v85_v41 }
 0x11d   :  { %v72_v46 = vpop.xlane.xlu0 %71 }
 0x11e   :  { %v88_v47 = vmul.f32 0.03125, %v72_v46  ;;  %v323_v46 = vld [vmem:[%s644_s5] sm:$0xff] }
 0x120   :  { %v94_v48 = vadd.f32 1e-05, %v88_v47 }
 0x121   :  { %v75_v49 = vpop.xlane.xlu1 %74  ;;  %v78_v50 = vpop.xlane.xlu0 %77 }
 0x122   :  { %462 = vrsqrt.f32 %v94_v48  ;;  %v89_v51 = vmul.f32 0.03125, %v75_v49  ;;  %v90_v52 = vmul.f32 0.03125, %v78_v50  ;;  %v496_v48 = vmov 0.0  }
 0x123   :  { %397 = vmatprep.mubr.f32.mxu1 %v496_v48 }
 0x124   :  { %v95_v53 = vadd.f32 1e-05, %v89_v51  ;;  %v96_v54 = vadd.f32 1e-05, %v90_v52 }
 0x125   :  { %v81_v55 = vpop.xlane.xlu1 %80  ;;  %v84_v56 = vpop.xlane.xlu0 %83 }
 0x126   :  { %464 = vrsqrt.f32 %v95_v53  ;;  %v91_v57 = vmul.f32 0.03125, %v81_v55  ;;  %v92_v58 = vmul.f32 0.03125, %v84_v56 }
 0x127   :  { %466 = vrsqrt.f32 %v96_v54 }
 0x128   :  { %v97_v59 = vadd.f32 1e-05, %v91_v57  ;;  %v98_v60 = vadd.f32 1e-05, %v92_v58 }
 0x129   :  { %v87_v61 = vpop.xlane.xlu1 %86 }
 0x12a   :  { %468 = vrsqrt.f32 %v97_v59  ;;  %v93_v62 = vmul.f32 0.03125, %v87_v61 }
 0x12b   :  { %470 = vrsqrt.f32 %v98_v60 }
 0x12c   :  { %v99_v63 = vadd.f32 1e-05, %v93_v62 }
 0x12e   :  { %472 = vrsqrt.f32 %v99_v63 }
 0x12f   :  { %v463_v0 = vpop.eup %462 }
 0x130   :  { %v106_v2 = vmul.f32 %v463_v0, %v559_v16 }
 0x132   :  { %v119_v3 = vmul.f32 %v428_v1, %v106_v2 }
 0x133   :  { %v465_v4 = vpop.eup %464 }
 0x134   :  { %v467_v6 = vpop.eup %466  ;;  %v107_v7 = vmul.f32 %v465_v4, %v567_v24  ;;  %v132_v10 = vadd.f32 %v429_v5, %v119_v3 }
 0x135   :  { %v108_v8 = vmul.f32 %v467_v6, %v561_v17 }
 0x136   :  { %v120_v9 = vmul.f32 %v428_v1, %v107_v7  ;;  %v156_v19 = vrot.slane %v132_v10, 1 }
 0x137   :  { %v469_v11 = vpop.eup %468  ;;  %v121_v12 = vmul.f32 %v428_v1, %v108_v8 }
 0x138   :  { %v471_v13 = vpop.eup %470  ;;  %v133_v14 = vadd.f32 %v429_v5, %v120_v9  ;;  %v109_v15 = vmul.f32 %v469_v11, %v569_v25 }
 0x139   :  { %v134_v16 = vadd.f32 %v429_v5, %v121_v12  ;;  %v110_v18 = vmul.f32 %v471_v13, %v577_v34 }
 0x13a   :  { %v157_v20 = vrot.slane %v133_v14, 1  ;;  %v122_v21 = vmul.f32 %v428_v1, %v109_v15 }
 0x13b   :  { %v473_v22 = vpop.eup %472  ;;  %v159_v23 = vrot.slane %v134_v16, 1  ;;  %v123_v24 = vmul.f32 %v428_v1, %v110_v18 }
 0x13c   :  { %v158_v17 = vsel %vm155_vm3, %v156_v19, %v157_v20  ;;  %v135_v26 = vadd.f32 %v429_v5, %v122_v21  ;;  %v111_v27 = vmul.f32 %v473_v22, %v579_v35  ;;  %v326_v35 = vld [vmem:[%s644_s5 + $0x18] sm:$0xff]  ;;  %s474_s5 = scalar_lea.vmem %s418_s27, 256 }
 0x13d   :  { %452 = vmatprep.mubr.msk.f32.mxu0 %vm34_vm2, %v158_v17  ;;  %v160_v28 = vsel %vm155_vm3, %v157_v20, %v159_v23  ;;  %v136_v25 = vadd.f32 %v429_v5, %v123_v24  ;;  %361 = vmatprep.subr.mxu1 %v326_v35  ;;  %p475_p0 = scmp.ne.s32.totalorder %s418_s27, %s474_s5  ;;  %p480_p2 = scmp.lt.s32.totalorder %s474_s5, %s474_s5 }
 0x13e   :  { %453 = vmatmul.mubr.msk.f32.vlgmr.msra.gmra.mxu0 %vm34_vm2, %v160_v28  ;;  %v161_v29 = vrot.slane %v135_v26, 1  ;;  %v124_v30 = vmul.f32 %v428_v1, %v111_v27  ;;  %362 = vmatpush1.msra.mxu1 %v325_v37 }
 0x13f   :  { %v162_v31 = vrot.slane %v136_v25, 1  ;;  %363 = vmatprep.subr.mxu1 %v324_v45  ;;  %p481_p3 = por %p480_p2, %p479_p1 }
 0x140   :  { %v137_v32 = vadd.f32 %v429_v5, %v124_v30  ;;  %364 = vmatpush1.msra.mxu1 %v323_v46 }
 0x141   :  { %v163_v33 = vsel %vm155_vm3, %v161_v29, %v162_v31  ;;  %p482_p4 = pnand %p481_p3, %p475_p0 }
 0x142   :  { %455 = vmatprep.mubr.msk.f32.mxu0 %vm34_vm2, %v163_v33  ;;  %v164_v34 = vrot.slane %v137_v32, 1 }
 0x144   :  { %v165_v36 = vsel %vm155_vm3, %v162_v31, %v164_v34 }
 0x145   :  { %456 = vmatmul.mubr.msk.f32.gmra.mxu0 %vm34_vm2, %v165_v36 }
 0x1fe   :  { %v454_v38 = vpop.f32.mrf.mxu0 }
 0x1ff   :  { %v246_v42 = vadd.f32 %v454_v38, %v430_v39 }
 0x200   :  { %v240_v40 = vpop.f32.mrf.mxu0 }
 0x201   :  { %v241_v41 = vadd.f32 %v430_v39, %v240_v40 }
 0x203   :  { %259 = vxpose.xlu0.b32.start [1/2] (short) (narrow) %v241_v41, 8 }
 0x205   :  { %v457_v43 = vpop.f32.mrf.mxu0 }
 0x206   :  { %v256_v49 = vadd.f32 %v457_v43, %v430_v39 }
 0x207   :  { %260 = vxpose.xlu0.b32.end [2/2] (short) (narrow) %v246_v42, 8  ;;  %v250_v44 = vpop.f32.mrf.mxu0 }
 0x208   :  { %v251_v47 = vadd.f32 %v430_v39, %v250_v44 }
 0x20a   :  { %291 = vxpose.xlu1.b32.start [1/2] (short) (narrow) %v251_v47, 8 }
 0x20e   :  { %292 = vxpose.xlu1.b32.end [2/2] (short) (narrow) %v256_v49, 8 }
 0x27f   :  { %v275_v50 = vpop.trf.xlu0 }
 0x286   :  { %v307_v51 = vpop.trf.xlu1 }
 0x287   :  { %v329_v52 = vcombine.low %v275_v50, %v307_v51 }
 0x289   :  { %435 = vmatmul.mubr.msk.f32.vlgmr.msra.gmra.mxu1 %vm330_vm4, %v329_v52 }
 0x349   :  { %v399_v53 = vpop.f32.mrf.mxu1 }
 0x34b   :  { %v401_v54 = vpop.f32.mrf.mxu1 }
 0x34c   :  { %v406_v55 = vcombine.low %v399_v53, %v401_v54  ;;  %v407_v56 = vcombine.high %v399_v53, %v401_v54 }
 0x34e   :  { %410 = vst [vmem:[#allocation2] sm:$0xff] %v406_v55  ;;  %411 = vst [vmem:[#allocation2 + $0x8] sm:$0xff] %v407_v56 }
 0x34f   :  { %485 = shalt.err (!%p482_p4)
}
 0x350   :  { %s498_s28 = smov 128   ;;  %s499_s29 = smov 8  }
 0x351   :  { %423 = dma.vmem_to_hbm [thread:$0]  %s418_s27, 256, %s645_s6, [#allocation3], %s498_s28, %s498_s28, %s499_s29  }
 0x352   :  { %494 = dma.done.wait [#allocation3], 256  }
 0x353   :  { %495 = vsyncadd [#allocation3], 4294967040 }
 0x354   :  { %427 = vsyncpa [#allocation3], 1 }

</bundles_post_ra>
